<compile_context>
chip_gen: v7x
topology: tpu7x:2x2x1
jax: 0.10.0
libtpu: 0.0.40
codegen_flags: <defaults>
</compile_context>

<pallas_src>
import jax
import jax.numpy as jnp
from jax.experimental import pallas as pl
from jax.experimental.pallas import tpu as pltpu


_VMEM_BUDGET = 48 * 1024 * 1024        # conservative cap: v7x has 64 MiB / TC
_COMPUTE_DTYPE = jnp.bfloat16          # MXU-native matmul dtype
_CB = 2                                # bytes per bf16 element


def _round_up(a, b):
    return (a + b - 1) // b * b


def _cdiv(a, b):
    return (a + b - 1) // b


def _row_tiling(M, tm_target):
    """Padding-aware row tile: pick the tile count first, then the tile size.

    Forces >= 2 row tiles whenever possible so the 'parallel' row axis can be
    sharded across both v7x TensorCores.
    """
    n = max(1, _cdiv(M, tm_target))
    if M > 8:
        n = max(n, 2)
    tm = _round_up(_cdiv(M, n), 8)
    return tm, _round_up(M, tm)


# ---------------------------------------------------------------------------
# Kernels
# ---------------------------------------------------------------------------

def _ffn_resident_kernel(x_ref, w1_ref, b1_ref, w2_ref, b2_ref, o_ref):
    """Weights fully VMEM-resident; one grid axis over row tiles."""
    # bf16 matmuls on the MXU; bias + Swish + accumulation in f32.
    h = jnp.dot(x_ref[...], w1_ref[...], preferred_element_type=jnp.float32)
    h = h + b1_ref[...].astype(jnp.float32)
    h = h * jax.nn.sigmoid(h)                      # Swish
    # TODO(synk): dropout (p=0.0 in the module default) is a no-op; not implemented.
    y = jnp.dot(h.astype(w2_ref.dtype), w2_ref[...],
                preferred_element_type=jnp.float32)
    o_ref[...] = (y + b2_ref[...].astype(jnp.float32)).astype(o_ref.dtype)


def _ffn_chunked_kernel(x_ref, w1_ref, b1_ref, w2_ref, b2_ref, o_ref, *scratch):
    """Hidden dimension chunked over grid axis 1 (large FFNs)."""
    # If the output is f32 we accumulate straight into o_ref (it is resident
    # across the hidden axis); otherwise we use the f32 scratch.
    acc_ref = scratch[0] if scratch else o_ref
    k = pl.program_id(1)

    @pl.when(k == 0)
    def _():
        # Fold b2 into the accumulator init.
        acc_ref[...] = jnp.broadcast_to(
            b2_ref[...].astype(jnp.float32), acc_ref.shape)

    h = jnp.dot(x_ref[...], w1_ref[...], preferred_element_type=jnp.float32)
    h = h + b1_ref[...].astype(jnp.float32)
    h = h * jax.nn.sigmoid(h)                      # Swish
    acc_ref[...] += jnp.dot(h.astype(w2_ref.dtype), w2_ref[...],
                            preferred_element_type=jnp.float32)

    if scratch:
        @pl.when(k == pl.num_programs(1) - 1)
        def _():
            o_ref[...] = acc_ref[...].astype(o_ref.dtype)


# ---------------------------------------------------------------------------
# Wrapper
# ---------------------------------------------------------------------------

def feed_forward(x, w1, b1, w2, b2, *, tm=512, th=1024, force_chunked=False):
    """x: [batch, seq, dim] -> [batch, seq, dim]."""
    B, S, dim = x.shape
    hidden = w1.shape[1]
    M = B * S
    out_dtype = x.dtype
    ob = jnp.dtype(out_dtype).itemsize

    # Padded extents: dim -> 128-lane aligned (lane-dense output stores),
    # hidden -> 256 aligned for the v6e/v7x 2x256x256 MXU (128 if tiny).
    dimp = _round_up(dim, 128)
    Hp = _round_up(hidden, 256 if hidden >= 256 else 128)

    # ---- VMEM working-set estimates (include the (tm, th) f32 intermediates).
    def resident_est(tm_):
        return (2 * tm_ * dimp * _CB            # x tile (double-buffered)
                + 2 * 2 * dimp * Hp * _CB       # W1 + W2 (2-buffer safety)
                + 2 * (Hp + dimp) * 4           # biases (f32)
                + 2 * tm_ * dimp * ob           # output tile
                + 3 * tm_ * Hp * 4              # h intermediates (f32 + temps)
                + tm_ * dimp * 4)               # y f32 temp

    def chunked_est(tm_, th_, need_scratch):
        wbuf = 3                                 # pl.Buffered(3) weight chunks
        return (2 * tm_ * dimp * _CB
                + wbuf * dimp * th_ * _CB
                + wbuf * th_ * dimp * _CB
                + 2 * (th_ + dimp) * 4
                + 2 * tm_ * dimp * ob
                + 3 * tm_ * th_ * 4
                + (tm_ * dimp * 4 if need_scratch else 0))

    weight_resident_bytes = 2 * 2 * dimp * Hp * _CB
    use_resident = (not force_chunked) and weight_resident_bytes <= 24 * 1024 * 1024

    if use_resident:
        tm_eff, Mp = _row_tiling(M, tm)
        while resident_est(tm_eff) > _VMEM_BUDGET and tm_eff > 8:
            tm_eff, Mp = _row_tiling(M, max(8, tm_eff // 2))
        if resident_est(tm_eff) > _VMEM_BUDGET:
            use_resident = False

    if use_resident:
        need_scratch = False
        th_eff = Hp
        est = resident_est(tm_eff)
    else:
        need_scratch = out_dtype != jnp.float32
        tm_eff, Mp = _row_tiling(M, tm)
        th_eff = max(256, min(_round_up(th, 256), _round_up(hidden, 256)))
        while chunked_est(tm_eff, th_eff, need_scratch) > _VMEM_BUDGET:
            if th_eff > 256:
                th_eff = max(256, _round_up(th_eff // 2, 256))
            elif tm_eff > 8:
                tm_eff, Mp = _row_tiling(M, max(8, tm_eff // 2))
            else:
                break
        Hp = _round_up(hidden, th_eff)
        est = chunked_est(tm_eff, th_eff, need_scratch)

    vmem_limit = int(min(_VMEM_BUDGET, max(est + (4 << 20), 32 << 20)))

    # ---- pad operands (zero padding is mathematically inert here) -----------
    x2 = x.reshape(M, dim)
    if (Mp, dimp) != (M, dim):
        x2 = jnp.pad(x2, ((0, Mp - M), (0, dimp - dim)))
    x2 = x2.astype(_COMPUTE_DTYPE)

    w1p = w1 if (dimp, Hp) == (dim, hidden) else jnp.pad(
        w1, ((0, dimp - dim), (0, Hp - hidden)))
    w1p = w1p.astype(_COMPUTE_DTYPE)
    w2p = w2 if (Hp, dimp) == (hidden, dim) else jnp.pad(
        w2, ((0, Hp - hidden), (0, dimp - dim)))
    w2p = w2p.astype(_COMPUTE_DTYPE)

    b1p = b1.reshape(1, hidden).astype(jnp.float32)
    if Hp != hidden:
        b1p = jnp.pad(b1p, ((0, 0), (0, Hp - hidden)))
    b2p = b2.reshape(1, dim).astype(jnp.float32)
    if dimp != dim:
        b2p = jnp.pad(b2p, ((0, 0), (0, dimp - dim)))

    # ---- cost estimate (helps XLA schedule around the custom call) ----------
    n_row_tiles = Mp // tm_eff
    weight_bytes = (w1p.size + w2p.size) * _CB + (b1p.size + b2p.size) * 4
    streamed_weight_bytes = weight_bytes if use_resident else weight_bytes * n_row_tiles
    cost = pl.CostEstimate(
        flops=4 * Mp * dimp * Hp,                 # 2 matmuls, 2*M*K*N each
        transcendentals=Mp * Hp,                  # sigmoid
        bytes_accessed=x2.size * _CB + Mp * dimp * ob + streamed_weight_bytes,
    )

    if use_resident:
        out = pl.pallas_call(
            _ffn_resident_kernel,
            out_shape=jax.ShapeDtypeStruct((Mp, dimp), out_dtype),
            grid_spec=pltpu.PrefetchScalarGridSpec(
                num_scalar_prefetch=0,
                grid=(n_row_tiles,),
                in_specs=[
                    pl.BlockSpec((tm_eff, dimp), lambda i: (i, 0)),   # x tile
                    pl.BlockSpec((dimp, Hp), lambda i: (0, 0)),       # W1 (resident)
                    pl.BlockSpec((1, Hp), lambda i: (0, 0)),          # b1
                    pl.BlockSpec((Hp, dimp), lambda i: (0, 0)),       # W2 (resident)
                    pl.BlockSpec((1, dimp), lambda i: (0, 0)),        # b2
                ],
                out_specs=pl.BlockSpec((tm_eff, dimp), lambda i: (i, 0)),
            ),
            compiler_params=pltpu.CompilerParams(
                dimension_semantics=("parallel",),
                vmem_limit_bytes=vmem_limit,
            ),
            cost_estimate=cost,
        )(x2, w1p, b1p, w2p, b2p)
    else:
        n_h_tiles = Hp // th_eff
        if n_h_tiles >= 3:
            w1_spec = pl.BlockSpec((dimp, th_eff), lambda i, k: (0, k),
                                   pipeline_mode=pl.Buffered(3))
            w2_spec = pl.BlockSpec((th_eff, dimp), lambda i, k: (k, 0),
                                   pipeline_mode=pl.Buffered(3))
        else:
            w1_spec = pl.BlockSpec((dimp, th_eff), lambda i, k: (0, k))
            w2_spec = pl.BlockSpec((th_eff, dimp), lambda i, k: (k, 0))

        scratch = [pltpu.VMEM((tm_eff, dimp), jnp.float32)] if need_scratch else []

        out = pl.pallas_call(
            _ffn_chunked_kernel,
            out_shape=jax.ShapeDtypeStruct((Mp, dimp), out_dtype),
            grid_spec=pltpu.PrefetchScalarGridSpec(
                num_scalar_prefetch=0,
                grid=(n_row_tiles, n_h_tiles),
                in_specs=[
                    pl.BlockSpec((tm_eff, dimp), lambda i, k: (i, 0)),  # x tile
                    w1_spec,                                            # W1 chunk
                    pl.BlockSpec((1, th_eff), lambda i, k: (0, k)),     # b1 chunk
                    w2_spec,                                            # W2 chunk
                    pl.BlockSpec((1, dimp), lambda i, k: (0, 0)),       # b2
                ],
                out_specs=pl.BlockSpec((tm_eff, dimp), lambda i, k: (i, 0)),
                scratch_shapes=scratch,
            ),
            compiler_params=pltpu.CompilerParams(
                dimension_semantics=("parallel", "arbitrary"),
                vmem_limit_bytes=vmem_limit,
            ),
            cost_estimate=cost,
        )(x2, w1p, b1p, w2p, b2p)

    return out[:M, :dim].reshape(B, S, dim)


def _reference(x, w1, b1, w2, b2):
    h = jnp.einsum("bsd,dh->bsh", x, w1) + b1
    h = h * jax.nn.sigmoid(h)
    return jnp.einsum("bsh,hd->bsd", h, w2) + b2


if __name__ == "__main__":
    key = jax.random.PRNGKey(0)

    def make_params(k, dim, hidden):
        kw1, kb1, kw2, kb2 = jax.random.split(k, 4)
        bound1 = 1.0 / (dim ** 0.5)
        bound2 = 1.0 / (hidden ** 0.5)
        w1 = jax.random.uniform(kw1, (dim, hidden), jnp.float32, -bound1, bound1)
        b1 = jax.random.uniform(kb1, (hidden,), jnp.float32, -bound1, bound1)
        w2 = jax.random.uniform(kw2, (hidden, dim), jnp.float32, -bound2, bound2)
        b2 = jax.random.uniform(kb2, (dim,), jnp.float32, -bound2, bound2)
        return w1, b1, w2, b2

    # --- Test A: module-sized shapes (resident-weight path). -----------------
    B, S, dim, mult = 2, 8, 32, 4
    hidden = dim * mult
    k0, k1 = jax.random.split(key)
    x = jax.random.normal(k0, (B, S, dim), dtype=jnp.float32)
    w1, b1, w2, b2 = make_params(k1, dim, hidden)
    y = jax.block_until_ready(feed_forward(x, w1, b1, w2, b2))
    y_ref = _reference(x, w1, b1, w2, b2)
    assert y.shape == (B, S, dim)
    # bf16 matmuls with f32 accumulation -> tolerance loosened vs pure-f32.
    assert jnp.allclose(y, y_ref, atol=2e-2, rtol=2e-2), (
        f"resident path mismatch, max err {jnp.max(jnp.abs(y - y_ref))}")

    # --- Test B: hidden-chunked path (forced), f32 output accumulates in o_ref.
    Bb, Sb, dimb, hiddenb = 2, 16, 64, 768
    k2, k3 = jax.random.split(k1)
    xb = jax.random.normal(k2, (Bb, Sb, dimb), dtype=jnp.float32)
    w1b, b1b, w2b, b2b = make_params(k3, dimb, hiddenb)
    yb = jax.block_until_ready(
        feed_forward(xb, w1b, b1b, w2b, b2b, th=256, force_chunked=True))
    yb_ref = _reference(xb, w1b, b1b, w2b, b2b)
    assert yb.shape == (Bb, Sb, dimb)
    assert jnp.allclose(yb, yb_ref, atol=2e-2, rtol=2e-2), (
        f"chunked path mismatch, max err {jnp.max(jnp.abs(yb - yb_ref))}")

    # --- Test C: chunked path with narrow (bf16) output -> f32 scratch. ------
    xc = x.astype(jnp.bfloat16)
    yc = jax.block_until_ready(
        feed_forward(xc, w1, b1, w2, b2, force_chunked=True))
    yc_ref = _reference(xc.astype(jnp.float32), w1, b1, w2, b2)
    assert yc.dtype == jnp.bfloat16
    assert jnp.allclose(yc.astype(jnp.float32), yc_ref, atol=3e-2, rtol=3e-2), (
        f"bf16 chunked mismatch, max err "
        f"{jnp.max(jnp.abs(yc.astype(jnp.float32) - yc_ref))}")

    print("KERNEL_OK")
</pallas_src>

<mosaic_0001>
module attributes {stable_mosaic.version = 11 : i64} {
  func.func @_ffn_resident_kernel(%arg0: i32, %arg1: memref<8x128xbf16, #tpu.memory_space<vmem>>, %arg2: memref<128x128xbf16, #tpu.memory_space<vmem>>, %arg3: memref<1x128xf32, #tpu.memory_space<vmem>>, %arg4: memref<128x128xbf16, #tpu.memory_space<vmem>>, %arg5: memref<1x128xf32, #tpu.memory_space<vmem>>, %arg6: memref<8x128xf32, #tpu.memory_space<vmem>>) attributes {dimension_semantics = [#tpu.dimension_semantics<parallel>], iteration_bounds = array<i64: 2>, scalar_prefetch = 0 : i64, scratch_operands = 0 : i64, tpu.core_type = #tpu.core_type<tc>, window_params = [{transform_indices = @transform_0, window_bounds = array<i64: 8, 128>}, {pipeline_mode = #tpu.pipeline_mode<synchronous>, transform_indices = @transform_1, window_bounds = array<i64: 128, 128>}, {pipeline_mode = #tpu.pipeline_mode<synchronous>, transform_indices = @transform_2, window_bounds = array<i64: 1, 128>}, {pipeline_mode = #tpu.pipeline_mode<synchronous>, transform_indices = @transform_3, window_bounds = array<i64: 128, 128>}, {pipeline_mode = #tpu.pipeline_mode<synchronous>, transform_indices = @transform_4, window_bounds = array<i64: 1, 128>}, {transform_indices = @transform_5, window_bounds = array<i64: 8, 128>}]} {
    %c0 = arith.constant 0 : index
    %c0_0 = arith.constant 0 : index
    %0 = vector.load %arg1[%c0, %c0_0] : memref<8x128xbf16, #tpu.memory_space<vmem>>, vector<8x128xbf16>
    %c0_1 = arith.constant 0 : index
    %c0_2 = arith.constant 0 : index
    %1 = vector.load %arg2[%c0_1, %c0_2] : memref<128x128xbf16, #tpu.memory_space<vmem>>, vector<128x128xbf16>
    %cst = arith.constant dense<0.000000e+00> : vector<8x128xf32>
    %2 = tpu.matmul %0, %1, %cst {dimension_numbers = #tpu.dot_dimension_numbers<[1], [0], [0], [1], [0, 0, 1, 1], [], []>} : vector<8x128xbf16>, vector<128x128xbf16>, vector<8x128xf32> -> vector<8x128xf32>
    %c0_3 = arith.constant 0 : index
    %c0_4 = arith.constant 0 : index
    %3 = vector.load %arg3[%c0_3, %c0_4] : memref<1x128xf32, #tpu.memory_space<vmem>>, vector<1x128xf32>
    %4 = vector.broadcast %3 : vector<1x128xf32> to vector<8x128xf32>
    %5 = arith.addf %2, %4 : vector<8x128xf32>
    %6 = arith.negf %5 : vector<8x128xf32>
    %7 = math.exp %6 : vector<8x128xf32>
    %cst_5 = arith.constant 1.000000e+00 : f32
    %8 = vector.broadcast %cst_5 : f32 to vector<8x128xf32>
    %9 = arith.addf %8, %7 : vector<8x128xf32>
    %10 = arith.divf %8, %9 : vector<8x128xf32>
    %11 = arith.mulf %5, %10 : vector<8x128xf32>
    %12 = arith.truncf %11 : vector<8x128xf32> to vector<8x128xbf16>
    %c0_6 = arith.constant 0 : index
    %c0_7 = arith.constant 0 : index
    %13 = vector.load %arg4[%c0_6, %c0_7] : memref<128x128xbf16, #tpu.memory_space<vmem>>, vector<128x128xbf16>
    %cst_8 = arith.constant dense<0.000000e+00> : vector<8x128xf32>
    %14 = tpu.matmul %12, %13, %cst_8 {dimension_numbers = #tpu.dot_dimension_numbers<[1], [0], [0], [1], [0, 0, 1, 1], [], []>} : vector<8x128xbf16>, vector<128x128xbf16>, vector<8x128xf32> -> vector<8x128xf32>
    %c0_9 = arith.constant 0 : index
    %c0_10 = arith.constant 0 : index
    %15 = vector.load %arg5[%c0_9, %c0_10] : memref<1x128xf32, #tpu.memory_space<vmem>>, vector<1x128xf32>
    %16 = vector.broadcast %15 : vector<1x128xf32> to vector<8x128xf32>
    %17 = arith.addf %14, %16 : vector<8x128xf32>
    %c0_11 = arith.constant 0 : index
    %c0_12 = arith.constant 0 : index
    %18 = vector.load %arg6[%c0_11, %c0_12] : memref<8x128xf32, #tpu.memory_space<vmem>>, vector<8x128xf32>
    tpu.vector_store %arg6[%c0_11, %c0_12], %17 {strides = array<i32>} : memref<8x128xf32, #tpu.memory_space<vmem>>, vector<8x128xf32>,
    return
  }
  func.func @transform_0(%arg0: i32) -> (i32, i32) {
    %c0_i32 = arith.constant 0 : i32
    %c0_i32_0 = arith.constant 0 : i32
    return %arg0, %c0_i32 : i32, i32
  }
  func.func @transform_1(%arg0: i32) -> (i32, i32) {
    %c0_i32 = arith.constant 0 : i32
    %c0_i32_0 = arith.constant 0 : i32
    %c0_i32_1 = arith.constant 0 : i32
    return %c0_i32, %c0_i32_0 : i32, i32
  }
  func.func @transform_2(%arg0: i32) -> (i32, i32) {
    %c0_i32 = arith.constant 0 : i32
    %c0_i32_0 = arith.constant 0 : i32
    %c0_i32_1 = arith.constant 0 : i32
    return %c0_i32, %c0_i32_0 : i32, i32
  }
  func.func @transform_3(%arg0: i32) -> (i32, i32) {
    %c0_i32 = arith.constant 0 : i32
    %c0_i32_0 = arith.constant 0 : i32
    %c0_i32_1 = arith.constant 0 : i32
    return %c0_i32, %c0_i32_0 : i32, i32
  }
  func.func @transform_4(%arg0: i32) -> (i32, i32) {
    %c0_i32 = arith.constant 0 : i32
    %c0_i32_0 = arith.constant 0 : i32
    %c0_i32_1 = arith.constant 0 : i32
    return %c0_i32, %c0_i32_0 : i32, i32
  }
  func.func @transform_5(%arg0: i32) -> (i32, i32) {
    %c0_i32 = arith.constant 0 : i32
    %c0_i32_0 = arith.constant 0 : i32
    return %arg0, %c0_i32 : i32, i32
  }
}

</mosaic_0001>

<bundles_post_ra>
// kernel: tpu_custom_call.1
= control target key start
LH: loop header
LB: loop body
LE: loop exit
PB: predicated region body
PF: predicated region fallthrough
CT: control target
= control target key end

     0   :  { %10 = vsyncpa [#allocation3], 0  ;;  %s1224_s0 = inlined_call_operand.hbm [shape: bf16[16,128], index: 0, kind: input, shape index: {}]   ;;  %s1225_s1 = inlined_call_operand.hbm [shape: bf16[128,128], index: 1, kind: input, shape index: {}]   ;;  %s1226_s2 = inlined_call_operand.vmem [shape: f32[1,128], index: 2, kind: input, shape index: {}]   ;;  %s1227_s3 = inlined_call_operand.hbm [shape: bf16[128,128], index: 3, kind: input, shape index: {}]   ;;  %s1228_s4 = inlined_call_operand.vmem [shape: f32[1,128], index: 4, kind: input, shape index: {}]   ;;  %s1229_s5 = inlined_call_operand.hbm [shape: f32[16,128], index: 5, kind: output, shape index: {}]  }
   0x1   :  { %12 = vsyncpa [#allocation3 + $0x1], 0 }
   0x2   :  { %13 = vsyncpa [#allocation6], 0 }
   0x3   :  { %14 = vsyncpa [#allocation4], 0 }
   0x4   :  { %16 = vsyncpa [#allocation4 + $0x1], 0  ;;  %s985_s18 = smov 0   ;;  %s987_s19 = smov 0  }
   0x5   :  { %s989_s20 = smov 0   ;;  %s991_s21 = smov 0  }
   0x6 LB: > { %s1006_s22 = sadd.s32 4294967295, %s945_s21   ;;  %s605_s23 = sadd.s32 4294967294, %s945_s21   ;;  %s945_s21 = sphi %s991_s21, %s1249_s21   ;;  %s941_s20 = sphi %s989_s20, %s1248_s20   ;;  %s937_s19 = sphi %s987_s19, %s1247_s19   ;;  %s933_s18 = sphi %s985_s18, %s1246_s18  }
   0x7   : > { %p42_p0 = scmp.ne.s32.totalorder %s937_s19, %s933_s18  ;;  %p1230_p1 = scmp.eq.s32.totalorder %s1006_s22, 0 }
   0x8   : > { %p156_p3 = scmp.eq.s32.totalorder %s605_s23, 1  ;;  %p606_p5 = scmp.ge.s32.totalorder %s945_s21, 1 }
   0x9   : > { %p1015_p4 = por %p1230_p1, %p42_p0  ;;  %p163_p7 = scmp.lt.s32.totalorder %s945_s21, 3 }
   0xa   : > { %p1020_p6 = por %p156_p3, %p42_p0  ;;  %s947_s27 = smov [#allocation5]  }
   0xb   : > { %s1233_s24 = scalar_select %p1015_p4, 1, 0 }
   0xc   : > { %s1234_s25 = scalar_select %p1020_p6, 1, 0 }
   0xd   : > { %p1025_p8 = pnand %p606_p5, %p163_p7  ;;  %s175_s28 = sshll.u32 %s947_s27, 4  ;;  %s1029_s28 = int_to_ptr.vmem [resolvable:$true] %s175_s28 }
   0xe   : > { %s948_s30 = smov [#allocation7]   ;;  %s789_s9 = scalar_lea.hbm %s1225_s1, 1024 }
   0xf   : > { %p710_p9 = pneg %p1025_p8  ;;  %s191_s6 = sshll.u32 %s948_s30, 4  ;;  %s1040_s6 = int_to_ptr.vmem [resolvable:$true] %s191_s6 }
  0x10   : > { %p790_p12 = scmp.ne.s32.totalorder %s1225_s1, %s789_s9  ;;  %p796_p5 = scmp.lt.u32.totalorder %s789_s9, %s1225_s1 }
  0x11   : > { %p1036_p11 = pnand %p710_p9, %p1230_p1 }
  0x13   : > { %p791_p13 = pneg %p1036_p11 }
  0x15   : > { %p792_p0 = pnand %p791_p13, %p790_p12 }
  0x17   : > { %p793_p3 = pneg %p792_p0 }
  0x19   : > { %p798_p7 = pnand %p796_p5, %p793_p3 }
  0x1b   : > { %801 = shalt.err (!%p798_p7)
}
  0x1c   : > { %s802_s14 = scalar_lea.vmem %s1029_s28, 1024  ;;  %p810_p2 = scmp.lt.s32.totalorder %s1029_s28, %s1029_s28 }
  0x1d   : > { %p803_p9 = scmp.ne.s32.totalorder %s1029_s28, %s802_s14  ;;  %p811_p12 = scmp.lt.s32.totalorder %s802_s14, %s802_s14 }
  0x1f   : > { %p805_p10 = pnand %p803_p9, %p791_p13  ;;  %p812_p0 = por %p811_p12, %p810_p2 }
  0x21   : > { %p806_p1 = pneg %p805_p10 }
  0x23   : > { %p813_p6 = pnand %p812_p0, %p806_p1 }
  0x25   : > { %816 = shalt.err (!%p813_p6)
}
  0x26   : > { %s949_s15 = smov 64   ;;  %s950_s16 = smov 4  }
  0x27   : > { %713 = dma.hbm_to_vmem [thread:$0]  (!%p1036_p11), %s1225_s1, 1024, %s1029_s28, [#allocation6], %s949_s15, %s949_s15, %s950_s16  }
  0x28   : > { %s817_s7 = scalar_lea.hbm %s1227_s3, 1024 }
  0x29   : > { %p818_p2 = scmp.ne.s32.totalorder %s1227_s3, %s817_s7  ;;  %p824_p10 = scmp.lt.u32.totalorder %s817_s7, %s1227_s3 }
  0x2b   : > { %p820_p1 = pnand %p818_p2, %p791_p13 }
  0x2d   : > { %p821_p6 = pneg %p820_p1 }
  0x2f   : > { %p826_p3 = pnand %p824_p10, %p821_p6 }
  0x31   : > { %829 = shalt.err (!%p826_p3)
}
  0x32   : > { %s830_s28 = scalar_lea.vmem %s1040_s6, 1024  ;;  %p838_p12 = scmp.lt.s32.totalorder %s1040_s6, %s1040_s6 }
  0x33   : > { %p831_p5 = scmp.ne.s32.totalorder %s1040_s6, %s830_s28  ;;  %p839_p0 = scmp.lt.s32.totalorder %s830_s28, %s830_s28 }
  0x35   : > { %p833_p7 = pnand %p831_p5, %p791_p13  ;;  %p840_p2 = por %p839_p0, %p838_p12 }
  0x37   : > { %p834_p9 = pneg %p833_p7 }
  0x39   : > { %p841_p1 = pnand %p840_p2, %p834_p9 }
  0x3b   : > { %844 = shalt.err (!%p841_p1)
}
  0x3c   : > { %716 = dma.hbm_to_vmem [thread:$0]  (!%p1036_p11), %s1227_s3, 1024, %s1040_s6, [#allocation6], %s949_s15, %s949_s15, %s950_s16  }
  0x3d   : > { %s1095_s14 = sadd.s32 1, %s945_s21   ;;  %s29_s29 = sadd.s32 1, %s941_s20 }
  0x3e   : > { %s26_s17 = ssub.s32 %s945_s21, %s1095_s14  ;;  %p36_p13 = scmp.ne.s32.totalorder %s941_s20, %s937_s19 }
  0x3f   : > { %p27_p6 = scmp.eq.s32.totalorder %s26_s17, 0  ;;  %p37_p10 = scmp.eq.s32.totalorder %s945_s21, 0 }
  0x40   : > { %p1237_p3 = scmp.eq.s32.totalorder %s1006_s22, 1  ;;  %p727_p7 = scmp.lt.s32.totalorder %s945_s21, 2 }
  0x41   : > { %s1111_s27 = scalar_select %p27_p6, %s941_s20, %s29_s29  }
  0x42   : > { %p1105_p5 = por %p1237_p3, %p36_p13  ;;  %p38_p9 = por %p37_p10, %p36_p13 }
  0x43   : > { %s208_s30 = sand.u32 1, %s941_s20   ;;  %s611_s6 = sshll.u32 %s945_s21, 6 }
  0x44   : > { %s1238_s23 = scalar_select %p1105_p5, 1, 0 }
  0x45   : > { %s610_s7 = sshll.u32 %s208_s30, 2  ;;  %s1118_s8 = scalar_lea.hbm %s1224_s0, %s611_s6 }
  0x46   : > { %s212_s9 = scalar_lea.vmem [#allocation2], %s610_s7  ;;  %p1122_p11 = pnand %p727_p7, %p38_p9 }
  0x47   : > { %s219_s10 = sshll.u32 %s212_s9, 4  ;;  %s209_s28 = scalar_lea.sflag [#allocation3], %s208_s30  ;;  %s1120_s10 = int_to_ptr.vmem [resolvable:$true] %s219_s10 }
  0x48   : > { %s845_s12 = scalar_lea.hbm %s1118_s8, 64  ;;  %p847_p0 = pneg %p1122_p11 }
  0x49   : > { %p846_p12 = scmp.ne.s32.totalorder %s1118_s8, %s845_s12  ;;  %s850_s17 = scalar_lea.hbm %s1224_s0, 128 }
  0x4a   : > { %p851_p13 = scmp.lt.u32.totalorder %s1118_s8, %s1224_s0  ;;  %p852_p6 = scmp.lt.u32.totalorder %s850_s17, %s845_s12 }
  0x4b   : > { %p848_p2 = pnand %p847_p0, %p846_p12  ;;  %p854_p3 = scmp.lt.u32.totalorder %s845_s12, %s1118_s8 }
  0x4c   : > { %p853_p10 = por %p852_p6, %p851_p13 }
  0x4d   : > { %p849_p1 = pneg %p848_p2 }
  0x4e   : > { %p855_p7 = por %p854_p3, %p853_p10 }
  0x50   : > { %p856_p9 = pnand %p855_p7, %p849_p1 }
  0x52   : > { %859 = shalt.err (!%p856_p9)
}
  0x53   : > { %s860_s30 = scalar_lea.vmem %s1120_s10, 64  ;;  %s951_s15 = smov [#allocation2]  }
  0x54   : > { %p861_p12 = scmp.ne.s32.totalorder %s1120_s10, %s860_s30  ;;  %s865_s16 = sshll.u32 %s951_s15, 4  ;;  %s866_s16 = int_to_ptr.vmem [resolvable:$false] %s865_s16 }
  0x55   : > { %s867_s9 = scalar_lea.vmem %s866_s16, 128  ;;  %p868_p4 = scmp.lt.s32.totalorder %s1120_s10, %s866_s16 }
  0x56   : > { %p863_p2 = pnand %p861_p12, %p847_p0  ;;  %p869_p13 = scmp.lt.s32.totalorder %s867_s9, %s860_s30 }
  0x58   : > { %p864_p5 = pneg %p863_p2  ;;  %p870_p6 = por %p869_p13, %p868_p4 }
  0x5a   : > { %p871_p10 = pnand %p870_p6, %p864_p5 }
  0x5c   : > { %874 = shalt.err (!%p871_p10)
}
  0x5d   : > { %720 = dma.hbm_to_vmem [thread:$0]  (!%p1122_p11), %s1118_s8, 64, %s1120_s10, %s209_s28  }
  0x5e   : > { %228 = sbr.rel (%p1025_p8) target bundleno = 611 (0x263), region = 40  ;;  %s1154_s12 = sand.u32 (!%p1025_p8), 1, %s937_s19  }
  0x5f   : > { %s613_s13 = sshll.u32 (!%p1025_p8), %s1154_s12, 2  ;;  %s231_s29 = scalar_lea.sflag (!%p1025_p8), [#allocation3], %s1154_s12 }
  0x60   : > { %s1158_s17 = scalar_lea.vmem (!%p1025_p8), [#allocation2], %s613_s13  ;;  %p1240_p4 = scmp.ne.s32.totalorder (!%p1025_p8), %s1233_s24, 0 }
  0x65   : > { %920 = dma.done.wait (%p1240_p4), %s231_s29, 64  }
  0x66   : > { %922 = vsyncadd (%p1240_p4), %s231_s29, 4294967232  ;;  %p1241_p5 = scmp.eq.s32.totalorder %s1006_s22, 0 }
  0x68   : > { %924 = dma.done.wait (%p1241_p5), [#allocation6], 2048   ;;  %p1242_p8 = pmov %p1241_p5 }
  0x69   : > { %v952_v0 = vmov 0.0   ;;  %vm953_vm0 = vmmov 0   ;;  %v769_v1 = vld [vmem:[#allocation5] sm:$0xff]   ;;  %v770_v2 = vld [vmem:[#allocation5 + $0x8] sm:$0xff]   ;;  %v771_v3 = vld [vmem:[#allocation5 + $0x10] sm:$0xff]   ;;  %s616_s8 = sshll.u32 %s1154_s12, 3 }
  0x6a   : > { %926 = vsyncadd (%p1242_p8), [#allocation6], 4294965248  ;;  %658 = vmatprep.subr.bf16.mxu0 %v952_v0  ;;  %674 = vmatprep.mubr.msk.bf16.mxu0 %vm953_vm0, %v952_v0  ;;  %v772_v4 = vld [vmem:[#allocation5 + $0x18] sm:$0xff]   ;;  %v773_v5 = vld [vmem:[#allocation5 + $0x20] sm:$0xff]   ;;  %s637_s28 = sshll.u32 %s1006_s22, 7  ;;  %s268_s7 = scalar_lea.vmem [#allocation8], %s616_s8 }
  0x6b   : > { %678 = vmatprep.subr.bf16.mxu1 %v952_v0  ;;  %694 = vmatprep.mubr.msk.bf16.mxu1 %vm953_vm0, %v952_v0  ;;  %v774_v6 = vld [vmem:[#allocation5 + $0x28] sm:$0xff]   ;;  %v775_v7 = vld [vmem:[#allocation5 + $0x30] sm:$0xff]   ;;  %v776_v8 = vld [vmem:[#allocation5 + $0x38] sm:$0xff]   ;;  %s516_s6 = sshll.u32 %s268_s7, 4  ;;  %s1180_s16 = scalar_lea.hbm %s1229_s5, %s637_s28  ;;  %s1182_s6 = int_to_ptr.vmem [resolvable:$true] %s516_s6 }
  0x6c   : > { %659 = vmatpush3.bf16.msra.mxu0 %v769_v1  ;;  %v270_v9 = vld [vmem:[%s1158_s17] sm:$0xf]  ;;  %v777_v10 = vld [vmem:[#allocation7] sm:$0xff]   ;;  %v778_v11 = vld [vmem:[#allocation7 + $0x8] sm:$0xff]   ;;  %s503_s9 = scalar_lea.sflag [#allocation4], %s1154_s12  ;;  %s875_s22 = scalar_lea.vmem %s1182_s6, 128 }
  0x6d   : > { %660 = vmatprep.subr.bf16.mxu0 %v952_v0  ;;  %679 = vmatpush3.bf16.msra.mxu1 %v777_v10  ;;  %v779_v12 = vld [vmem:[#allocation7 + $0x10] sm:$0xff]   ;;  %v780_v13 = vld [vmem:[#allocation7 + $0x18] sm:$0xff]   ;;  %v781_v14 = vld [vmem:[#allocation7 + $0x20] sm:$0xff]   ;;  %p876_p11 = scmp.ne.s32.totalorder %s1182_s6, %s875_s22  ;;  %p1243_p0 = scmp.ne.s32.totalorder %s1238_s23, 0 }
  0x6e   : > { %680 = vmatprep.subr.bf16.mxu1 %v952_v0  ;;  %v782_v15 = vld [vmem:[#allocation7 + $0x28] sm:$0xff]   ;;  %v783_v16 = vld [vmem:[#allocation7 + $0x30] sm:$0xff]   ;;  %v784_v17 = vld [vmem:[#allocation7 + $0x38] sm:$0xff]   ;;  %s954_s13 = smov [#allocation8]  }
  0x6f   : > { %v617_v18 = vld [vmem:[%s1226_s2] ss:$0 sm:$0xff]  ;;  %p877_p1 = pnand %p876_p11, %p1243_p0  ;;  %s879_s29 = sshll.u32 %s954_s13, 4  ;;  %s880_s29 = int_to_ptr.vmem [resolvable:$false] %s879_s29 }
  0x70   : > { %661 = vmatpush3.bf16.msra.mxu0 %v770_v2  ;;  %v627_v30 = vld [vmem:[%s1228_s4] ss:$0 sm:$0xff]  ;;  %s881_s17 = scalar_lea.vmem %s880_s29, 256  ;;  %p882_p7 = scmp.lt.s32.totalorder %s1182_s6, %s880_s29 }
  0x71   : > { %662 = vmatprep.subr.bf16.mxu0 %v952_v0  ;;  %681 = vmatpush3.bf16.msra.mxu1 %v778_v11  ;;  %p878_p3 = pneg %p877_p1  ;;  %p883_p9 = scmp.lt.s32.totalorder %s881_s17, %s875_s22 }
  0x72   : > { %682 = vmatprep.subr.bf16.mxu1 %v952_v0 }
  0x73   : > { %p884_p12 = por %p883_p9, %p882_p7 }
  0x74   : > { %663 = vmatpush3.bf16.msra.mxu0 %v771_v3 }
  0x75   : > { %664 = vmatprep.subr.bf16.mxu0 %v952_v0  ;;  %683 = vmatpush3.bf16.msra.mxu1 %v779_v12  ;;  %p885_p2 = pnand %p884_p12, %p878_p3 }
  0x76   : > { %684 = vmatprep.subr.bf16.mxu1 %v952_v0 }
  0x78   : > { %665 = vmatpush3.bf16.msra.mxu0 %v772_v4 }
  0x79   : > { %666 = vmatprep.subr.bf16.mxu0 %v952_v0  ;;  %685 = vmatpush3.bf16.msra.mxu1 %v780_v13 }
  0x7a   : > { %686 = vmatprep.subr.bf16.mxu1 %v952_v0 }
  0x7c   : > { %667 = vmatpush3.bf16.msra.mxu0 %v773_v5 }
  0x7d   : > { %668 = vmatprep.subr.bf16.mxu0 %v952_v0  ;;  %687 = vmatpush3.bf16.msra.mxu1 %v781_v14 }
  0x7e   : > { %688 = vmatprep.subr.bf16.mxu1 %v952_v0 }
  0x80   : > { %669 = vmatpush3.bf16.msra.mxu0 %v774_v6 }
  0x81   : > { %670 = vmatprep.subr.bf16.mxu0 %v952_v0  ;;  %689 = vmatpush3.bf16.msra.mxu1 %v782_v15 }
  0x82   : > { %690 = vmatprep.subr.bf16.mxu1 %v952_v0 }
  0x84   : > { %671 = vmatpush3.bf16.msra.mxu0 %v775_v7 }
  0x85   : > { %672 = vmatprep.subr.bf16.mxu0 %v952_v0  ;;  %691 = vmatpush3.bf16.msra.mxu1 %v783_v16 }
  0x86   : > { %692 = vmatprep.subr.bf16.mxu1 %v952_v0 }
  0x88   : > { %673 = vmatpush3.bf16.msra.mxu0 %v776_v8 }
  0x89   : > { %693 = vmatpush3.bf16.msra.mxu1 %v784_v17 }
  0x8b   : > { %675 = vmatmul.mubr.bf16.vlgmr.msra.gmra.mrb[0].mxu0 %v270_v9 }
 0x15e   : > { %v376_v19 = vpop.f32.mrb[0].mxu0 }
 0x15f   : > { %v377_v20 = vadd.f32 %v617_v18, %v376_v19  ;;  %v676_v21 = vpop.f32.mrb[1].mxu0 }
 0x160   : > { %v379_v22 = vpop.f32.mrb[2].mxu0 }
 0x161   : > { %v626_v23 = vmul.f32 -1.442695, %v377_v20  ;;  %v677_v24 = vpop.f32.mrb[3].mxu0 }
 0x163   : > { %785 = vpow2.f32 %v626_v23 }
 0x16d   : > { %v786_v25 = vpop.eup %785 }
 0x16e   : > { %v385_v26 = vadd.f32 1.0, %v786_v25 }
 0x170   : > { %787 = vrcp.f32 %v385_v26 }
 0x17a   : > { %v788_v27 = vpop.eup %787 }
 0x17b   : > { %v388_v28 = vmul.f32 %v788_v27, %v377_v20 }
 0x17d   : > { %v389_v29 = vpack.c.bf16 %v388_v28, %v388_v28 }
 0x17f   : > { %695 = vmatmul.mubr.bf16.vlgmr.msra.gmra.mrb[0].mxu1 %v389_v29 }
 0x252   : > { %v495_v31 = vpop.f32.mrb[0].mxu1 }
 0x253   : > { %v496_v32 = vadd.f32 %v627_v30, %v495_v31  ;;  %v696_v33 = vpop.f32.mrb[1].mxu1 }
 0x254   : > { %v498_v34 = vpop.f32.mrb[2].mxu1 }
 0x255   : > { %501 = vst [vmem:[%s268_s7] sm:$0xff] %v496_v32  ;;  %v697_v35 = vpop.f32.mrb[3].mxu1 }
 0x256   : > { %888 = shalt.err (!%p885_p2)
}
 0x257   : > { %s889_s12 = scalar_lea.hbm %s1180_s16, 128  ;;  %s893_s8 = scalar_lea.hbm %s1229_s5, 256 }
 0x258   : > { %p890_p13 = scmp.ne.s32.totalorder %s1180_s16, %s889_s12  ;;  %p894_p4 = scmp.lt.u32.totalorder %s1180_s16, %s1229_s5 }
 0x259   : > { %p895_p5 = scmp.lt.u32.totalorder %s893_s8, %s889_s12  ;;  %p897_p11 = scmp.lt.u32.totalorder %s889_s12, %s1180_s16 }
 0x25a   : > { %p891_p6 = pnand %p890_p13, %p1243_p0 }
 0x25b   : > { %p896_p8 = por %p895_p5, %p894_p4 }
 0x25c   : > { %p892_p10 = pneg %p891_p6 }
 0x25d   : > { %p898_p1 = por %p897_p11, %p896_p8 }
 0x25f   : > { %p899_p3 = pnand %p898_p1, %p892_p10 }
 0x261   : > { %902 = shalt.err (!%p899_p3)
}
 0x262   : > { %708 = dma.vmem_to_hbm [thread:$0]  (%p1243_p0), %s1182_s6, 128, %s1180_s16, %s503_s9  }
 0x263 PF: > { %s528_s28 = sand.u32 1, %s933_s18   ;;  %p1244_p7 = scmp.ne.s32.totalorder %s1234_s25, 0 }
 0x264   : > { %p1245_p9 = scmp.ge.s32.totalorder %s945_s21, 2  ;;  %s529_s7 = scalar_lea.sflag [#allocation4], %s528_s28 }
 0x266   : > { %p722_p12 = pnand %p1245_p9, %p1244_p7 }
 0x268   : > { %928 = dma.done.wait (!%p722_p12), %s529_s7, 128  }
 0x269   : > { %930 = vsyncadd (!%p722_p12), %s529_s7, 4294967168  ;;  %p19_p2 = scmp.ge.s32.totalorder %s1095_s14, 4   ;;  %s1246_s18 = smov %s937_s19 }
 0x26a   : > { %s1247_s19 = smov %s941_s20  ;;  %s1248_s20 = smov %s1111_s27 }
 0x26b   : > { %s1249_s21 = smov %s1095_s14  ;;  %21 = sbr.rel (!%p19_p2) target bundleno = 6 (0x6), region = 93 }
 0x272   :  { %534 = vsyncpa [#allocation3], 1 }
 0x273   :  { %536 = vsyncpa [#allocation3 + $0x1], 1 }
 0x274   :  { %537 = vsyncpa [#allocation6], 1 }
 0x275   :  { %538 = vsyncpa [#allocation4], 1 }
 0x276   :  { %540 = vsyncpa [#allocation4 + $0x1], 1 }

</bundles_post_ra>
